<compile_context>
chip_gen: v6e
topology: v6e:2x2x1
jax: 0.10.0
libtpu: 0.0.40
codegen_flags: <defaults>
</compile_context>

<pallas_src>
import functools

import jax
import jax.numpy as jnp
from jax import lax
from jax.experimental import pallas as pl
from jax.experimental.pallas import tpu as pltpu


def _upconv_kernel(x_ref, halo_ref, w_ref, b_ref, o_ref, *, width, tile_h):
    """One (batch, row-tile) grid step.

    x_ref:    (1, Cin, L)         flattened input rows of this tile, L = tile_h*W
    halo_ref: (1, Cin, 1, 2, W)   rows just above / below this tile (clamped)
    w_ref:    (9, 4*Cout, Cin)    folded per-slab weights, phases stacked on M
    b_ref:    (4*Cout, 1)         bias, phase-stacked (f32)
    o_ref:    (1, 1, 4*Cout, L)   phase-major output, lane-dense last dim
    """
    r = pl.program_id(1)
    num_r = pl.num_programs(1)

    x = x_ref[0]                                   # (Cin, L), lane-dense
    cin, L = x.shape

    # Lane-index masks, built once (JAX does not CSE broadcasts).
    lane = lax.broadcasted_iota(jnp.int32, (cin, L), 1)
    col = lane % width
    row_first = lane < width                       # first row of this tile
    row_last = lane >= L - width                   # last row of this tile
    col_first = col == 0
    col_last = col == width - 1

    # Halo rows; zeroed at the true image border (conv zero padding).
    top = halo_ref[0, :, 0, 0, :]                  # (Cin, W)
    bot = halo_ref[0, :, 0, 1, :]                  # (Cin, W)
    top = jnp.where(r == 0, jnp.zeros_like(top), top)
    bot = jnp.where(r == num_r - 1, jnp.zeros_like(bot), bot)
    top_t = jnp.tile(top, (1, tile_h))             # halo replicated per row slot
    bot_t = jnp.tile(bot, (1, tile_h))

    # Row-shifted bases (XLU rolls; wrap rows replaced by the halo rows):
    #   base_a[i, j] = x[i + a, j]   for a = -1, 0, +1
    r_up = jnp.where(row_first, top_t, pltpu.roll(x, width, 1))      # a = -1
    r_dn = jnp.where(row_last, bot_t, pltpu.roll(x, L - width, 1))   # a = +1
    bases = (r_up, x, r_dn)

    acc = None
    s = 0
    for base in bases:                             # row shift a = -1, 0, +1
        left = jnp.where(col_first, 0.0, pltpu.roll(base, 1, 1))      # b = -1
        right = jnp.where(col_last, 0.0, pltpu.roll(base, L - 1, 1))  # b = +1
        for slab in (left, base, right):           # col shift b = -1, 0, +1
            contrib = jnp.dot(w_ref[s], slab,
                              preferred_element_type=jnp.float32)     # (4*Cout, L)
            acc = contrib if acc is None else acc + contrib
            s += 1

    acc = jnp.maximum(acc + b_ref[...], 0.0)       # bias + ReLU on f32 acc
    o_ref[0, 0, :, :] = acc.astype(o_ref.dtype)    # lane-dense store


def _fold_phase_weights(weight_oihw):
    """Fold the 3x3 kernel (applied to the nearest-2x-upsampled image) into a
    phase-stacked weight of shape (9, 4*Cout, Cin).

    Slab s = 3*(a+1) + (b+1) corresponds to the original-resolution neighbour
    x[i+a, j+b]; rows [p*Cout, (p+1)*Cout) correspond to output parity phase
    p = 2*py + px.  Unused slab/phase combinations are zero (the extra MACs are
    free while the MXU is M/K-underutilized at decoder channel counts)."""
    cout, cin = weight_oihw.shape[0], weight_oihw.shape[1]
    # taps[parity][shift index (-1, 0, +1)] -> 3x3 tap indices that land there.
    taps = (((0,), (1, 2), ()),     # parity 0
            ((), (0, 1), (2,)))     # parity 1
    phases = []
    for py in range(2):
        for px in range(2):
            blocks = []
            for a in range(3):
                for b in range(3):
                    w_sum = jnp.zeros((cout, cin), weight_oihw.dtype)
                    for kh in taps[py][a]:
                        for kw in taps[px][b]:
                            w_sum = w_sum + weight_oihw[:, :, kh, kw]
                    blocks.append(w_sum)                    # (Cout, Cin)
            phases.append(jnp.stack(blocks, axis=0))        # (9, Cout, Cin)
    return jnp.concatenate(phases, axis=1)                  # (9, 4*Cout, Cin)


def _pick_row_tile(H, W, cin, cout, itemsize, budget_bytes):
    """Largest row-tile H_t (a divisor of H) whose double-buffered blocks fit
    the VMEM budget, preferring H_t*W % 128 == 0 (lane-dense stores) and at
    least two row tiles (pipeline steps / v7x megacore work)."""
    def vmem_est(ht):
        L = ht * W
        x_blk = cin * L * itemsize
        halo = cin * 2 * W * itemsize
        out_blk = 4 * cout * L * 4
        w = 9 * 4 * cout * cin * itemsize
        slabs = 9 * cin * L * itemsize
        return 2 * (x_blk + halo + out_blk) + w + slabs

    divisors = [d for d in range(H, 0, -1) if H % d == 0]
    fits = [d for d in divisors if vmem_est(d) <= budget_bytes] or [1]
    lane_ok = [d for d in fits if (d * W) % 128 == 0]
    pool = lane_ok or fits
    multi = [d for d in pool if H // d >= 2]
    return (multi or pool)[0]


def unet_decoder_block(x_nchw, weight_oihw, bias, *, compute_dtype=None,
                       vmem_budget_bytes=24 * 1024 * 1024):
    """Forward of UnetDecoderBlock: nearest 2x upsample -> conv3x3(pad=1) -> ReLU.

    x_nchw:      (N, Cin, H, W)
    weight_oihw: (Cout, Cin, 3, 3)   PyTorch conv layout
    bias:        (Cout,)
    compute_dtype: feed dtype for activations/weights (e.g. jnp.bfloat16 on
                   v6e/v7x); accumulation, bias and ReLU stay in f32.
    returns:     (N, Cout, 2H, 2W) in x's dtype
    """
    N, Cin, H, W = x_nchw.shape
    Cout = weight_oihw.shape[0]
    out_dtype = x_nchw.dtype
    cdt = compute_dtype or x_nchw.dtype

    tile_h = _pick_row_tile(H, W, Cin, Cout, jnp.dtype(cdt).itemsize,
                            vmem_budget_bytes)
    R = H // tile_h
    L = tile_h * W

    w_folded = _fold_phase_weights(weight_oihw).astype(cdt)     # (9, 4*Cout, Cin)
    b2d = jnp.tile(bias, 4).reshape(4 * Cout, 1).astype(jnp.float32)

    x_flat = x_nchw.reshape(N, Cin, H * W).astype(cdt)          # free reshape
    # Tiny halo side-array: the row just above / below each row tile (clamped
    # at the image border; the kernel masks those to zero).
    top_rows = [max(r * tile_h - 1, 0) for r in range(R)]
    bot_rows = [min((r + 1) * tile_h, H - 1) for r in range(R)]
    halo_idx = jnp.array(list(zip(top_rows, bot_rows)), dtype=jnp.int32)  # (R, 2)
    x_halo = x_nchw.astype(cdt)[:, :, halo_idx, :]              # (N, Cin, R, 2, W)

    kernel = functools.partial(_upconv_kernel, width=W, tile_h=tile_h)

    out_k = pl.pallas_call(
        kernel,
        out_shape=jax.ShapeDtypeStruct((N, R, 4 * Cout, L), out_dtype),
        grid_spec=pltpu.PrefetchScalarGridSpec(
            num_scalar_prefetch=0,
            grid=(N, R),
            in_specs=[
                pl.BlockSpec((1, Cin, L), lambda n, r: (n, 0, r)),
                pl.BlockSpec((1, Cin, 1, 2, W), lambda n, r: (n, 0, r, 0, 0)),
                # TODO(synk): pipeline_mode=pl.Buffered(1) on the two constant
                # specs below would save one weight copy of VMEM at production
                # channel counts (kept default-buffered here for portability).
                pl.BlockSpec((9, 4 * Cout, Cin), lambda n, r: (0, 0, 0)),
                pl.BlockSpec((4 * Cout, 1), lambda n, r: (0, 0)),
            ],
            out_specs=pl.BlockSpec((1, 1, 4 * Cout, L),
                                   lambda n, r: (n, r, 0, 0)),
        ),
        compiler_params=pltpu.CompilerParams(
            dimension_semantics=("parallel", "parallel"),
            vmem_limit_bytes=32 * 1024 * 1024),
    )(x_flat, x_halo, w_folded, b2d)

    # Phase de-interleave rides on the single (unavoidable) NCHW-restore pass.
    # A consumer that accepts the phase-major (N, R, 4*Cout, H_t*W) layout can
    # skip this transpose entirely.
    out = out_k.reshape(N, R, 2, 2, Cout, tile_h, W)   # (n, r, py, px, co, i, j)
    out = jnp.transpose(out, (0, 4, 1, 5, 2, 6, 3))    # (n, co, r, i, py, j, px)
    return out.reshape(N, Cout, 2 * H, 2 * W)


def _reference(x_nchw, weight_oihw, bias):
    """Pure-JAX reference (upsample + conv + relu) for the correctness check."""
    x_up = jnp.repeat(jnp.repeat(x_nchw, 2, axis=2), 2, axis=3)
    out = jax.lax.conv_general_dilated(
        x_up, weight_oihw,
        window_strides=(1, 1), padding=((1, 1), (1, 1)),
        dimension_numbers=("NCHW", "OIHW", "NCHW"))
    out = out + bias.reshape(1, -1, 1, 1)
    return jnp.maximum(out, 0.0)


if __name__ == "__main__":
    key = jax.random.PRNGKey(0)
    k_x, k_w, k_b = jax.random.split(key, 3)

    N, Cin, Cout, H, W = 2, 4, 8, 16, 16
    x = jax.random.normal(k_x, (N, Cin, H, W), dtype=jnp.float32)
    weight = jax.random.normal(k_w, (Cout, Cin, 3, 3), dtype=jnp.float32) * 0.1
    bias = jax.random.normal(k_b, (Cout,), dtype=jnp.float32) * 0.1

    ref = _reference(x, weight, bias)

    # f32 feed (exercises the row-tiling + halo path: H=16 -> 2 row tiles).
    out = jax.block_until_ready(unet_decoder_block(x, weight, bias))
    assert out.shape == (N, Cout, 2 * H, 2 * W), out.shape
    assert jnp.allclose(out, ref, atol=1e-3, rtol=1e-3), "f32 mismatch vs reference"

    # bf16 feed (v6e/v7x MXU path): bf16 activations/weights, f32 accumulation.
    out_bf16 = jax.block_until_ready(
        unet_decoder_block(x, weight, bias, compute_dtype=jnp.bfloat16))
    assert out_bf16.shape == (N, Cout, 2 * H, 2 * W)
    assert jnp.allclose(out_bf16, ref, atol=1e-1, rtol=1e-1), "bf16 mismatch vs reference"

    print("KERNEL_OK")
</pallas_src>

<mosaic_0001>
module attributes {stable_mosaic.version = 11 : i64} {
  func.func @_upconv_kernel(%arg0: i32, %arg1: i32, %arg2: memref<1x4x128xf32, #tpu.memory_space<vmem>>, %arg3: memref<1x4x1x2x16xf32, #tpu.memory_space<vmem>>, %arg4: memref<9x32x4xf32, #tpu.memory_space<vmem>>, %arg5: memref<32x1xf32, #tpu.memory_space<vmem>>, %arg6: memref<1x1x32x128xf32, #tpu.memory_space<vmem>>) attributes {dimension_semantics = [#tpu.dimension_semantics<parallel>, #tpu.dimension_semantics<parallel>], iteration_bounds = array<i64: 2, 2>, scalar_prefetch = 0 : i64, scratch_operands = 0 : i64, tpu.core_type = #tpu.core_type<tc>, window_params = [{transform_indices = @transform_0, window_bounds = array<i64: 1, 4, 128>}, {transform_indices = @transform_1, window_bounds = array<i64: 1, 4, 1, 2, 16>}, {pipeline_mode = #tpu.pipeline_mode<synchronous>, transform_indices = @transform_2, window_bounds = array<i64: 9, 32, 4>}, {pipeline_mode = #tpu.pipeline_mode<synchronous>, transform_indices = @transform_3, window_bounds = array<i64: 32, 1>}, {transform_indices = @transform_4, window_bounds = array<i64: 1, 1, 32, 128>}]} {
    %c0 = arith.constant 0 : index
    %c0_0 = arith.constant 0 : index
    %c0_1 = arith.constant 0 : index
    %0 = vector.load %arg2[%c0, %c0_0, %c0_1] : memref<1x4x128xf32, #tpu.memory_space<vmem>>, vector<1x4x128xf32>
    %1 = vector.shape_cast %0 : vector<1x4x128xf32> to vector<4x128xf32>
    %2 = tpu.iota {dimensions = array<i32: 1>} : vector<4x128xi32>
    %c16_i32 = arith.constant 16 : i32
    %c0_i32 = arith.constant 0 : i32
    %3 = arith.cmpi eq, %c16_i32, %c0_i32 : i32
    %c1_i32 = arith.constant 1 : i32
    %4 = arith.select %3, %c1_i32, %c16_i32 : i32
    %5 = vector.broadcast %4 : i32 to vector<4x128xi32>
    %6 = arith.remsi %2, %5 : vector<4x128xi32>
    %c0_i32_2 = arith.constant 0 : i32
    %7 = vector.broadcast %c0_i32_2 : i32 to vector<4x128xi32>
    %8 = arith.cmpi ne, %6, %7 : vector<4x128xi32>
    %c0_i32_3 = arith.constant 0 : i32
    %9 = vector.broadcast %c0_i32_3 : i32 to vector<4x128xi32>
    %10 = arith.cmpi slt, %6, %9 : vector<4x128xi32>
    %c0_i32_4 = arith.constant 0 : i32
    %11 = arith.cmpi slt, %4, %c0_i32_4 : i32
    %12 = vector.broadcast %11 : i1 to vector<4x128xi1>
    %13 = vector.broadcast %12 : vector<4x128xi1> to vector<4x128xi1>
    %14 = arith.xori %10, %13 : vector<4x128xi1>
    %15 = arith.andi %14, %8 : vector<4x128xi1>
    %16 = vector.broadcast %4 : i32 to vector<4x128xi32>
    %17 = arith.addi %6, %16 : vector<4x128xi32>
    %18 = arith.select %15, %17, %6 : vector<4x128xi1>, vector<4x128xi32>
    %c16_i32_5 = arith.constant 16 : i32
    %19 = vector.broadcast %c16_i32_5 : i32 to vector<4x128xi32>
    %20 = arith.cmpi slt, %2, %19 : vector<4x128xi32>
    %c112_i32 = arith.constant 112 : i32
    %21 = vector.broadcast %c112_i32 : i32 to vector<4x128xi32>
    %22 = arith.cmpi sge, %2, %21 : vector<4x128xi32>
    %c0_i32_6 = arith.constant 0 : i32
    %23 = vector.broadcast %c0_i32_6 : i32 to vector<4x128xi32>
    %24 = arith.cmpi eq, %18, %23 : vector<4x128xi32>
    %c15_i32 = arith.constant 15 : i32
    %25 = vector.broadcast %c15_i32 : i32 to vector<4x128xi32>
    %26 = arith.cmpi eq, %18, %25 : vector<4x128xi32>
    %c0_7 = arith.constant 0 : index
    %c0_8 = arith.constant 0 : index
    %c0_9 = arith.constant 0 : index
    %c0_10 = arith.constant 0 : index
    %c0_11 = arith.constant 0 : index
    %27 = vector.load %arg3[%c0_7, %c0_8, %c0_9, %c0_10, %c0_11] : memref<1x4x1x2x16xf32, #tpu.memory_space<vmem>>, vector<1x4x1x1x16xf32>
    %28 = vector.shape_cast %27 : vector<1x4x1x1x16xf32> to vector<4x16xf32>
    %c0_12 = arith.constant 0 : index
    %c0_13 = arith.constant 0 : index
    %c0_14 = arith.constant 0 : index
    %c1 = arith.constant 1 : index
    %c0_15 = arith.constant 0 : index
    %29 = vector.load %arg3[%c0_12, %c0_13, %c0_14, %c1, %c0_15] : memref<1x4x1x2x16xf32, #tpu.memory_space<vmem>>, vector<1x4x1x1x16xf32>
    %30 = vector.shape_cast %29 : vector<1x4x1x1x16xf32> to vector<4x16xf32>
    %c0_i32_16 = arith.constant 0 : i32
    %31 = arith.cmpi eq, %arg1, %c0_i32_16 : i32
    %cst = arith.constant 0.000000e+00 : f32
    %32 = vector.broadcast %cst : f32 to vector<4x16xf32>
    %33 = arith.select %31, %32, %28 : vector<4x16xf32>
    %c1_i32_17 = arith.constant 1 : i32
    %34 = arith.cmpi eq, %arg1, %c1_i32_17 : i32
    %cst_18 = arith.constant 0.000000e+00 : f32
    %35 = vector.broadcast %cst_18 : f32 to vector<4x16xf32>
    %36 = arith.select %34, %35, %30 : vector<4x16xf32>
    %37 = tpu.concatenate %33, %33, %33, %33, %33, %33, %33, %33 in 1 : vector<4x16xf32>, vector<4x16xf32>, vector<4x16xf32>, vector<4x16xf32>, vector<4x16xf32>, vector<4x16xf32>, vector<4x16xf32>, vector<4x16xf32> -> vector<4x128xf32>
    %38 = tpu.concatenate %36, %36, %36, %36, %36, %36, %36, %36 in 1 : vector<4x16xf32>, vector<4x16xf32>, vector<4x16xf32>, vector<4x16xf32>, vector<4x16xf32>, vector<4x16xf32>, vector<4x16xf32>, vector<4x16xf32> -> vector<4x128xf32>
    %c16_i32_19 = arith.constant 16 : i32
    %39 = tpu.dynamic_rotate %1 by %c16_i32_19 dim 1 : vector<4x128xf32>, i32 -> vector<4x128xf32>
    %40 = arith.select %20, %37, %39 : vector<4x128xi1>, vector<4x128xf32>
    %c112_i32_20 = arith.constant 112 : i32
    %41 = tpu.dynamic_rotate %1 by %c112_i32_20 dim 1 : vector<4x128xf32>, i32 -> vector<4x128xf32>
    %42 = arith.select %22, %38, %41 : vector<4x128xi1>, vector<4x128xf32>
    %c1_i32_21 = arith.constant 1 : i32
    %43 = tpu.dynamic_rotate %40 by %c1_i32_21 dim 1 : vector<4x128xf32>, i32 -> vector<4x128xf32>
    %cst_22 = arith.constant 0.000000e+00 : f32
    %44 = vector.broadcast %cst_22 : f32 to vector<4x128xf32>
    %45 = arith.select %24, %44, %43 : vector<4x128xi1>, vector<4x128xf32>
    %c127_i32 = arith.constant 127 : i32
    %46 = tpu.dynamic_rotate %40 by %c127_i32 dim 1 : vector<4x128xf32>, i32 -> vector<4x128xf32>
    %cst_23 = arith.constant 0.000000e+00 : f32
    %47 = vector.broadcast %cst_23 : f32 to vector<4x128xf32>
    %48 = arith.select %26, %47, %46 : vector<4x128xi1>, vector<4x128xf32>
    %c0_24 = arith.constant 0 : index
    %c0_25 = arith.constant 0 : index
    %c0_26 = arith.constant 0 : index
    %49 = vector.load %arg4[%c0_24, %c0_25, %c0_26] : memref<9x32x4xf32, #tpu.memory_space<vmem>>, vector<1x32x4xf32>
    %50 = vector.shape_cast %49 : vector<1x32x4xf32> to vector<32x4xf32>
    %cst_27 = arith.constant dense<0.000000e+00> : vector<32x128xf32>
    %51 = tpu.matmul %50, %45, %cst_27 {dimension_numbers = #tpu.dot_dimension_numbers<[1], [0], [0], [1], [0, 0, 1, 1], [], []>} : vector<32x4xf32>, vector<4x128xf32>, vector<32x128xf32> -> vector<32x128xf32>
    %c1_28 = arith.constant 1 : index
    %c0_29 = arith.constant 0 : index
    %c0_30 = arith.constant 0 : index
    %52 = vector.load %arg4[%c1_28, %c0_29, %c0_30] : memref<9x32x4xf32, #tpu.memory_space<vmem>>, vector<1x32x4xf32>
    %53 = vector.shape_cast %52 : vector<1x32x4xf32> to vector<32x4xf32>
    %cst_31 = arith.constant dense<0.000000e+00> : vector<32x128xf32>
    %54 = tpu.matmul %53, %40, %cst_31 {dimension_numbers = #tpu.dot_dimension_numbers<[1], [0], [0], [1], [0, 0, 1, 1], [], []>} : vector<32x4xf32>, vector<4x128xf32>, vector<32x128xf32> -> vector<32x128xf32>
    %55 = arith.addf %51, %54 : vector<32x128xf32>
    %c2 = arith.constant 2 : index
    %c0_32 = arith.constant 0 : index
    %c0_33 = arith.constant 0 : index
    %56 = vector.load %arg4[%c2, %c0_32, %c0_33] : memref<9x32x4xf32, #tpu.memory_space<vmem>>, vector<1x32x4xf32>
    %57 = vector.shape_cast %56 : vector<1x32x4xf32> to vector<32x4xf32>
    %cst_34 = arith.constant dense<0.000000e+00> : vector<32x128xf32>
    %58 = tpu.matmul %57, %48, %cst_34 {dimension_numbers = #tpu.dot_dimension_numbers<[1], [0], [0], [1], [0, 0, 1, 1], [], []>} : vector<32x4xf32>, vector<4x128xf32>, vector<32x128xf32> -> vector<32x128xf32>
    %59 = arith.addf %55, %58 : vector<32x128xf32>
    %c1_i32_35 = arith.constant 1 : i32
    %60 = tpu.dynamic_rotate %1 by %c1_i32_35 dim 1 : vector<4x128xf32>, i32 -> vector<4x128xf32>
    %cst_36 = arith.constant 0.000000e+00 : f32
    %61 = vector.broadcast %cst_36 : f32 to vector<4x128xf32>
    %62 = arith.select %24, %61, %60 : vector<4x128xi1>, vector<4x128xf32>
    %c127_i32_37 = arith.constant 127 : i32
    %63 = tpu.dynamic_rotate %1 by %c127_i32_37 dim 1 : vector<4x128xf32>, i32 -> vector<4x128xf32>
    %cst_38 = arith.constant 0.000000e+00 : f32
    %64 = vector.broadcast %cst_38 : f32 to vector<4x128xf32>
    %65 = arith.select %26, %64, %63 : vector<4x128xi1>, vector<4x128xf32>
    %c3 = arith.constant 3 : index
    %c0_39 = arith.constant 0 : index
    %c0_40 = arith.constant 0 : index
    %66 = vector.load %arg4[%c3, %c0_39, %c0_40] : memref<9x32x4xf32, #tpu.memory_space<vmem>>, vector<1x32x4xf32>
    %67 = vector.shape_cast %66 : vector<1x32x4xf32> to vector<32x4xf32>
    %cst_41 = arith.constant dense<0.000000e+00> : vector<32x128xf32>
    %68 = tpu.matmul %67, %62, %cst_41 {dimension_numbers = #tpu.dot_dimension_numbers<[1], [0], [0], [1], [0, 0, 1, 1], [], []>} : vector<32x4xf32>, vector<4x128xf32>, vector<32x128xf32> -> vector<32x128xf32>
    %69 = arith.addf %59, %68 : vector<32x128xf32>
    %c4 = arith.constant 4 : index
    %c0_42 = arith.constant 0 : index
    %c0_43 = arith.constant 0 : index
    %70 = vector.load %arg4[%c4, %c0_42, %c0_43] : memref<9x32x4xf32, #tpu.memory_space<vmem>>, vector<1x32x4xf32>
    %71 = vector.shape_cast %70 : vector<1x32x4xf32> to vector<32x4xf32>
    %cst_44 = arith.constant dense<0.000000e+00> : vector<32x128xf32>
    %72 = tpu.matmul %71, %1, %cst_44 {dimension_numbers = #tpu.dot_dimension_numbers<[1], [0], [0], [1], [0, 0, 1, 1], [], []>} : vector<32x4xf32>, vector<4x128xf32>, vector<32x128xf32> -> vector<32x128xf32>
    %73 = arith.addf %69, %72 : vector<32x128xf32>
    %c5 = arith.constant 5 : index
    %c0_45 = arith.constant 0 : index
    %c0_46 = arith.constant 0 : index
    %74 = vector.load %arg4[%c5, %c0_45, %c0_46] : memref<9x32x4xf32, #tpu.memory_space<vmem>>, vector<1x32x4xf32>
    %75 = vector.shape_cast %74 : vector<1x32x4xf32> to vector<32x4xf32>
    %cst_47 = arith.constant dense<0.000000e+00> : vector<32x128xf32>
    %76 = tpu.matmul %75, %65, %cst_47 {dimension_numbers = #tpu.dot_dimension_numbers<[1], [0], [0], [1], [0, 0, 1, 1], [], []>} : vector<32x4xf32>, vector<4x128xf32>, vector<32x128xf32> -> vector<32x128xf32>
    %77 = arith.addf %73, %76 : vector<32x128xf32>
    %c1_i32_48 = arith.constant 1 : i32
    %78 = tpu.dynamic_rotate %42 by %c1_i32_48 dim 1 : vector<4x128xf32>, i32 -> vector<4x128xf32>
    %cst_49 = arith.constant 0.000000e+00 : f32
    %79 = vector.broadcast %cst_49 : f32 to vector<4x128xf32>
    %80 = arith.select %24, %79, %78 : vector<4x128xi1>, vector<4x128xf32>
    %c127_i32_50 = arith.constant 127 : i32
    %81 = tpu.dynamic_rotate %42 by %c127_i32_50 dim 1 : vector<4x128xf32>, i32 -> vector<4x128xf32>
    %cst_51 = arith.constant 0.000000e+00 : f32
    %82 = vector.broadcast %cst_51 : f32 to vector<4x128xf32>
    %83 = arith.select %26, %82, %81 : vector<4x128xi1>, vector<4x128xf32>
    %c6 = arith.constant 6 : index
    %c0_52 = arith.constant 0 : index
    %c0_53 = arith.constant 0 : index
    %84 = vector.load %arg4[%c6, %c0_52, %c0_53] : memref<9x32x4xf32, #tpu.memory_space<vmem>>, vector<1x32x4xf32>
    %85 = vector.shape_cast %84 : vector<1x32x4xf32> to vector<32x4xf32>
    %cst_54 = arith.constant dense<0.000000e+00> : vector<32x128xf32>
    %86 = tpu.matmul %85, %80, %cst_54 {dimension_numbers = #tpu.dot_dimension_numbers<[1], [0], [0], [1], [0, 0, 1, 1], [], []>} : vector<32x4xf32>, vector<4x128xf32>, vector<32x128xf32> -> vector<32x128xf32>
    %87 = arith.addf %77, %86 : vector<32x128xf32>
    %c7 = arith.constant 7 : index
    %c0_55 = arith.constant 0 : index
    %c0_56 = arith.constant 0 : index
    %88 = vector.load %arg4[%c7, %c0_55, %c0_56] : memref<9x32x4xf32, #tpu.memory_space<vmem>>, vector<1x32x4xf32>
    %89 = vector.shape_cast %88 : vector<1x32x4xf32> to vector<32x4xf32>
    %cst_57 = arith.constant dense<0.000000e+00> : vector<32x128xf32>
    %90 = tpu.matmul %89, %42, %cst_57 {dimension_numbers = #tpu.dot_dimension_numbers<[1], [0], [0], [1], [0, 0, 1, 1], [], []>} : vector<32x4xf32>, vector<4x128xf32>, vector<32x128xf32> -> vector<32x128xf32>
    %91 = arith.addf %87, %90 : vector<32x128xf32>
    %c8 = arith.constant 8 : index
    %c0_58 = arith.constant 0 : index
    %c0_59 = arith.constant 0 : index
    %92 = vector.load %arg4[%c8, %c0_58, %c0_59] : memref<9x32x4xf32, #tpu.memory_space<vmem>>, vector<1x32x4xf32>
    %93 = vector.shape_cast %92 : vector<1x32x4xf32> to vector<32x4xf32>
    %cst_60 = arith.constant dense<0.000000e+00> : vector<32x128xf32>
    %94 = tpu.matmul %93, %83, %cst_60 {dimension_numbers = #tpu.dot_dimension_numbers<[1], [0], [0], [1], [0, 0, 1, 1], [], []>} : vector<32x4xf32>, vector<4x128xf32>, vector<32x128xf32> -> vector<32x128xf32>
    %95 = arith.addf %91, %94 : vector<32x128xf32>
    %c0_61 = arith.constant 0 : index
    %c0_62 = arith.constant 0 : index
    %96 = vector.load %arg5[%c0_61, %c0_62] : memref<32x1xf32, #tpu.memory_space<vmem>>, vector<32x1xf32>
    %97 = vector.broadcast %96 : vector<32x1xf32> to vector<32x128xf32>
    %98 = arith.addf %95, %97 : vector<32x128xf32>
    %cst_63 = arith.constant 0.000000e+00 : f32
    %99 = vector.broadcast %cst_63 : f32 to vector<32x128xf32>
    %100 = arith.maximumf %98, %99 : vector<32x128xf32>
    %c0_64 = arith.constant 0 : index
    %c0_65 = arith.constant 0 : index
    %c0_66 = arith.constant 0 : index
    %c0_67 = arith.constant 0 : index
    %101 = vector.load %arg6[%c0_64, %c0_65, %c0_66, %c0_67] : memref<1x1x32x128xf32, #tpu.memory_space<vmem>>, vector<1x1x32x128xf32>
    %102 = vector.shape_cast %101 : vector<1x1x32x128xf32> to vector<32x128xf32>
    %103 = vector.shape_cast %100 : vector<32x128xf32> to vector<1x1x32x128xf32>
    tpu.vector_store %arg6[%c0_64, %c0_65, %c0_66, %c0_67], %103 {strides = array<i32>} : memref<1x1x32x128xf32, #tpu.memory_space<vmem>>, vector<1x1x32x128xf32>,
    return
  }
  func.func @transform_0(%arg0: i32, %arg1: i32) -> (i32, i32, i32) {
    %c0_i32 = arith.constant 0 : i32
    %c0_i32_0 = arith.constant 0 : i32
    return %arg0, %c0_i32, %arg1 : i32, i32, i32
  }
  func.func @transform_1(%arg0: i32, %arg1: i32) -> (i32, i32, i32, i32, i32) {
    %c0_i32 = arith.constant 0 : i32
    %c0_i32_0 = arith.constant 0 : i32
    %c0_i32_1 = arith.constant 0 : i32
    %c0_i32_2 = arith.constant 0 : i32
    return %arg0, %c0_i32, %arg1, %c0_i32_0, %c0_i32_1 : i32, i32, i32, i32, i32
  }
  func.func @transform_2(%arg0: i32, %arg1: i32) -> (i32, i32, i32) {
    %c0_i32 = arith.constant 0 : i32
    %c0_i32_0 = arith.constant 0 : i32
    %c0_i32_1 = arith.constant 0 : i32
    %c0_i32_2 = arith.constant 0 : i32
    return %c0_i32, %c0_i32_0, %c0_i32_1 : i32, i32, i32
  }
  func.func @transform_3(%arg0: i32, %arg1: i32) -> (i32, i32) {
    %c0_i32 = arith.constant 0 : i32
    %c0_i32_0 = arith.constant 0 : i32
    %c0_i32_1 = arith.constant 0 : i32
    return %c0_i32, %c0_i32_0 : i32, i32
  }
  func.func @transform_4(%arg0: i32, %arg1: i32) -> (i32, i32, i32, i32) {
    %c0_i32 = arith.constant 0 : i32
    %c0_i32_0 = arith.constant 0 : i32
    %c0_i32_1 = arith.constant 0 : i32
    return %arg0, %arg1, %c0_i32, %c0_i32_0 : i32, i32, i32, i32
  }
}

</mosaic_0001>

<bundles_post_ra>
// kernel: tpu_custom_call.1
= control target key start
LH: loop header
LB: loop body
LE: loop exit
PB: predicated region body
PF: predicated region fallthrough
CT: control target
= control target key end

     0   :  { %9 = vsyncpa [#allocation4], 0  ;;  %s2443_s0 = inlined_call_operand.vmem [shape: f32[2,4,256], index: 0, kind: input, shape index: {}]   ;;  %s2444_s1 = inlined_call_operand.vmem [shape: f32[2,4,2,2,16], index: 1, kind: input, shape index: {}]   ;;  %s2445_s2 = inlined_call_operand.vmem [shape: f32[9,32,4], index: 2, kind: input, shape index: {}]   ;;  %s2446_s3 = inlined_call_operand.vmem [shape: f32[32,1], index: 3, kind: input, shape index: {}]   ;;  %s2447_s4 = inlined_call_operand.hbm [shape: f32[2,2,32,128], index: 4, kind: output, shape index: {}]  }
   0x1   :  { %11 = vsyncpa [#allocation4 + $0x1], 0  ;;  %s2014_s15 = smov 0   ;;  %s2016_s16 = smov 0  }
   0x2   :  { %s2018_s17 = smov 0   ;;  %s2020_s18 = smov 0  }
   0x3   :  { %s2022_s19 = smov 0   ;;  %s2024_s20 = smov 0  }
   0x4   :  { %s2026_s21 = smov 0   ;;  %s2028_s22 = smov 0  }
   0x5 LB: > { %s1583_s23 = sadd.s32 4294967295, %s1974_s22   ;;  %s1584_s24 = sadd.s32 4294967294, %s1974_s22   ;;  %s1974_s22 = sphi %s2028_s22, %s17_s22   ;;  %s1970_s21 = sphi %s2026_s21, %s2463_s21   ;;  %s1966_s20 = sphi %s2024_s20, %s2462_s20   ;;  %s1962_s19 = sphi %s2022_s19, %s2461_s19   ;;  %s1958_s18 = sphi %s2020_s18, %s2460_s18   ;;  %s1954_s17 = sphi %s2018_s17, %s2459_s17   ;;  %s1950_s16 = sphi %s2016_s16, %s2458_s16   ;;  %s1946_s15 = sphi %s2014_s15, %s2457_s15  }
   0x6   : > { %s26_s25 = sadd.s32 1, %s1966_s20  ;;  %s29_s26 = sadd.s32 1, %s1970_s21 }
   0x7   : > { %p27_p0 = scmp.ge.s32.totalorder %s26_s25, 2  ;;  %p73_p1 = scmp.ne.s32.totalorder %s1954_s17, %s1950_s16 }
   0x8   : > { %p74_p2 = scmp.eq.s32.totalorder %s1974_s22, 0  ;;  %p147_p5 = scmp.eq.s32.totalorder %s1583_s23, 3 }
   0x9   : > { %s2465_s25 = smov (%p27_p0, %s26_s25), 0  ;;  %s2467_s26 = smov (!%p27_p0, %s29_s26), %s1970_s21 }
   0xa   : > { %s62_s27 = ssub.s32 %s1966_s20, %s2465_s25  ;;  %p2066_p3 = por %p74_p2, %p73_p1 }
   0xb   : > { %p31_p4 = scmp.ge.s32.totalorder %s2467_s26, 2  ;;  %p152_p6 = scmp.ne.s32.totalorder %s1950_s16, %s1946_s15 }
   0xc   : > { %p153_p7 = scmp.eq.s32.totalorder %s1584_s24, 3  ;;  %p2074_p8 = por %p147_p5, %p73_p1 }
   0xd   : > { %s2469_s26 = smov (%p31_p4, %s2467_s26), 0  ;;  %s66_s7 = sadd.s32 1, %s1954_s17 }
   0xe   : > { %p2078_p9 = por %p153_p7, %p152_p6  ;;  %s61_s5 = ssub.s32 %s1970_s21, %s2469_s26 }
   0xf   : > { %s63_s6 = sor.u32 %s62_s27, %s61_s5  ;;  %p1586_p11 = scmp.ge.s32.totalorder %s1974_s22, 4 }
  0x10   : > { %p64_p10 = scmp.eq.s32.totalorder %s63_s6, 0 }
  0x11   : > { %175 = sbr.rel (%p1586_p11) target bundleno = 30 (0x1e), region = 24 }
  0x12   : > { %s2086_s8 = scalar_select %p64_p10, %s1954_s17, %s66_s7  }
  0x16   : > { %189 = sbr.rel (!%p2066_p3) target bundleno = 30 (0x1e), region = 32  ;;  %s191_s9 = sand.u32 (%p2066_p3), 1, %s1954_s17  }
  0x17   : > { %s1588_s10 = sshll.u32 (%p2066_p3), %s1970_s21, 3  ;;  %s1587_s11 = sshll.u32 (%p2066_p3), %s191_s9, 3 }
  0x18   : > { %s195_s12 = sadd.s32 (%p2066_p3), %s1966_s20, %s1588_s10  ;;  %s193_s27 = scalar_lea.vmem (%p2066_p3), [#allocation2], %s1587_s11 }
  0x19   : > { %s1589_s13 = sshll.u32 (%p2066_p3), %s195_s12, 1 }
  0x1a   : > { %s197_s24 = scalar_lea.vmem (%p2066_p3), %s2444_s1, %s1589_s13 }
  0x1b   : > { %v214_v0 = vld [vmem:[%s197_s24] sm:$0x3]  ;;  %v216_v1 = vld [vmem:[%s197_s24 + $0x4] sm:$0x3]  ;;  %v218_v2 = vld [vmem:[%s197_s24 + $0x8] sm:$0x3] }
  0x1c   : > { %215 = vst [vmem:[%s193_s27] sm:$0x3] %v214_v0  ;;  %217 = vst [vmem:[%s193_s27 + $0x2] sm:$0x3] %v216_v1  ;;  %v220_v3 = vld [vmem:[%s197_s24 + $0xc] sm:$0x3] }
  0x1d   : > { %219 = vst [vmem:[%s193_s27 + $0x4] sm:$0x3] %v218_v2  ;;  %221 = vst [vmem:[%s193_s27 + $0x6] sm:$0x3] %v220_v3 }
  0x1e PF: > { %p1590_p12 = scmp.ge.s32.totalorder %s1974_s22, 1  ;;  %p252_p13 = scmp.lt.s32.totalorder %s1974_s22, 5 }
  0x20   : > { %p253_p0 = pnand %p1590_p12, %p252_p13 }
  0x21   : > { %s2100_s28 = sand.u32 (!%p253_p0), 1, %s1950_s16   ;;  %p327_p1 = scmp.eq.s32.totalorder (!%p253_p0), %s1958_s18, 0 }
  0x22   : > { %256 = sbr.rel (%p253_p0) target bundleno = 541 (0x21d), region = 73  ;;  %s1591_s5 = sshll.u32 (!%p253_p0), %s2100_s28, 3 }
  0x23   : > { %s2104_s6 = scalar_lea.vmem (!%p253_p0), [#allocation2], %s1591_s5  ;;  %p292_p2 = scmp.lt.s32.totalorder (!%p253_p0), %s1962_s19, 1 }
  0x24   : > { %p294_p3 = scmp.lt.s32.totalorder (!%p253_p0), %s1958_s18, 1  ;;  %p335_p4 = scmp.eq.s32.totalorder (!%p253_p0), %s1958_s18, 1 }
  0x25   : > { %s1976_s12 = smov (!%p253_p0), 16   ;;  %s1977_s13 = smov (!%p253_p0), 48  }
  0x26   : > { %s1978_s27 = smov (!%p253_p0), 32   ;;  %s1979_s5 = smov (!%p253_p0), 64  }
  0x27   : > { %v319_v4 = vld [vmem:[%s2104_s6] sm:$0x1]  ;;  %s328_s7 = scalar_select %p327_p1, 1, 0  ;;  %v320_v5 = vld [vmem:[%s2104_s6 + $0x2] sm:$0x1]  ;;  %v301_v40 = vlaneseq }
  0x28   : > { %v321_v6 = vld [vmem:[%s2104_s6 + $0x4] sm:$0x1]  ;;  %v322_v7 = vld [vmem:[%s2104_s6 + $0x6] sm:$0x1]  ;;  %vm348_vm1 = vcmask 1041409   ;;  %vm351_vm2 = vcmask 1042434  }
  0x29   : > { %v329_v8 = vstv %s328_s7  ;;  %s293_s9 = scalar_select %p292_p2, %s1962_s19, 1  ;;  %vm354_vm3 = vcmask 1043459   ;;  %v323_v20 = vld [vmem:[%s2104_s6 + $0x1] sm:$0x1]  ;;  %v324_v21 = vld [vmem:[%s2104_s6 + $0x3] sm:$0x1] }
  0x2a   : > { %vm2110_vm0 = vcmp.eq.s32.totalorder %v329_v8, 1  ;;  %s295_s10 = scalar_select %p294_p3, %s1958_s18, 1  ;;  %v325_v22 = vld [vmem:[%s2104_s6 + $0x5] sm:$0x1]  ;;  %v326_v23 = vld [vmem:[%s2104_s6 + $0x7] sm:$0x1] }
  0x2b   : > { %v331_v10 = vsel %vm2110_vm0, 0.0, %v319_v4  ;;  %v332_v11 = vsel %vm2110_vm0, 0.0, %v320_v5  ;;  %v333_v12 = vsel %vm2110_vm0, 0.0, %v321_v6  ;;  %v334_v13 = vsel %vm2110_vm0, 0.0, %v322_v7  ;;  %s1593_s11 = sshll.u32 %s293_s9, 1  ;;  %s1981_s6 = smov 96  }
  0x2c   : > { %v347_v14 = vrot.slane %v332_v11, 7  ;;  %v350_v15 = vrot.slane %v333_v12, 6  ;;  %v353_v16 = vrot.slane %v334_v13, 5  ;;  %s297_s14 = sadd.s32 %s1593_s11, %s295_s10  ;;  %s1980_s11 = smov 80   ;;  %v1597_v36 = vld [vmem:[%s2445_s2 + $0x30] sm:$0xff]  ;;  %vm452_vm5 = vcmask 31744  }
  0x2d   : > { %s336_s23 = scalar_select %p335_p4, 1, 0  ;;  %v1595_v37 = vld [vmem:[%s2445_s2 + $0x20] sm:$0xff]  ;;  %1728 = vmatprep.mubr.msk.f32.mxu1 %vm452_vm5, %v1597_v36  ;;  %vm378_vm6 = vcmask 130048   ;;  %vm380_vm7 = vcmask 261120   ;;  %vm382_vm8 = vcmask 392192  }
  0x2e   : > { %v349_v17 = vsel %vm348_vm1, %v347_v14, %v331_v10  ;;  %s1594_s24 = sshll.u32 %s297_s14, 2  ;;  %s1982_s14 = smov 112   ;;  %1725 = vmatprep.mubr.msk.f32.mxu0 %vm452_vm5, %v1595_v37  ;;  %vm384_vm9 = vcmask 523264   ;;  %vm386_vm10 = vcmask 654336   ;;  %v2163_v47 = vand.u32 127, %v301_v40  ;;  %v1598_v56 = vld [vmem:[%s2445_s2 + $0x38] sm:$0xff] }
  0x2f   : > { %v352_v18 = vsel %vm351_vm2, %v350_v15, %v349_v17  ;;  %v337_v24 = vstv %s336_s23  ;;  %s299_s10 = scalar_lea.vmem %s2443_s0, %s1594_s24  ;;  %vm388_vm11 = vcmask 785408   ;;  %vm390_vm12 = vcmask 916480   ;;  %v1596_v57 = vld [vmem:[%s2445_s2 + $0x28] sm:$0xff]  ;;  %v443_v61 = vld [vmem:[%s2445_s2] sm:$0xff]  ;;  %v1432_v15 = vld [vmem:[%s2446_s3 + $0x18] sm:$0xff]  ;;  %s1674_s23 = sshll.u32 %s1962_s19, 3 }
  0x30   : > { %v355_v19 = vsel %vm354_vm3, %v353_v16, %v352_v18  ;;  %vm338_vm4 = vcmp.eq.s32.totalorder %v337_v24, 1  ;;  %v2141_v32 = vld [vmem:[%s299_s10] sm:$0xf]  ;;  %vm315_vm13 = vcmp.lt.s32.totalorder %v2163_v47, 16  ;;  %vm465_vm14 = vcmask 1043456   ;;  %v1430_v12 = vld [vmem:[%s2446_s3 + $0x8] sm:$0xff] }
  0x31   : > { %357 = vrot.lane.b32.xlu0 %v355_v19, %s1976_s12  ;;  %363 = vrot.lane.b32.xlu1 %v355_v19, %s1977_s13  ;;  %v339_v25 = vsel %vm338_vm4, 0.0, %v323_v20  ;;  %v340_v26 = vsel %vm338_vm4, 0.0, %v324_v21  ;;  %v341_v27 = vsel %vm338_vm4, 0.0, %v325_v22  ;;  %v342_v28 = vsel %vm338_vm4, 0.0, %v326_v23  ;;  %v1609_v62 = vld [vmem:[%s2445_s2 + $0x40] sm:$0xff]  ;;  %v1431_v16 = vld [vmem:[%s2446_s3 + $0x10] sm:$0xff] }
  0x32   : > { %v396_v29 = vrot.slane %v340_v26, 7  ;;  %v398_v30 = vrot.slane %v341_v27, 6  ;;  %v400_v33 = vrot.slane %v342_v28, 5  ;;  %vm316_vm15 = vcmp.ge.s32.totalorder %v2163_v47, 112  ;;  %v1429_v13 = vld [vmem:[%s2446_s3] sm:$0xff]  ;;  %v444_v24 = vld [vmem:[%s2445_s2 + $0x8] sm:$0xff] }
  0x33   : > { %v1985_v14 = vmov 0   ;;  %v307_v17 = vand.u32 15, %v2163_v47  ;;  %v445_v26 = vld [vmem:[%s2445_s2 + $0x10] sm:$0xff]  ;;  %v1627_v36 = vld [vmem:[%s2445_s2 + $0x80] sm:$0xff]  ;;  %v1619_v37 = vld [vmem:[%s2445_s2 + $0x68] sm:$0xff]  ;;  %s1466_s10 = scalar_lea.sflag [#allocation4], %s2100_s28 }
  0x34   : > { %v397_v31 = vsel %vm348_vm1, %v396_v29, %v339_v25  ;;  %1881 = vset.pattern.permute.xlu1 %v1985_v14  ;;  %1880 = vset.pattern.permute.xlu0 %v1985_v14  ;;  %v1610_v25 = vld [vmem:[%s2445_s2 + $0x48] sm:$0xff]  ;;  %v1611_v27 = vld [vmem:[%s2445_s2 + $0x50] sm:$0xff]  ;;  %v1621_v40 = vld [vmem:[%s2445_s2 + $0x78] sm:$0xff] }
  0x35   : > { %360 = vrot.lane.b32.xlu0 %v355_v19, %s1978_s27  ;;  %366 = vrot.lane.b32.xlu1 %v355_v19, %s1979_s5  ;;  %v399_v34 = vsel %vm351_vm2, %v398_v30, %v397_v31  ;;  %vm2222_vm0 = vcmp.eq.s32.totalorder %v307_v17, 15  ;;  %vm2226_vm1 = vcmp.eq.s32.totalorder %v307_v17, 0  ;;  %v446_v31 = vld [vmem:[%s2445_s2 + $0x18] sm:$0xff]  ;;  %v1637_v47 = vld [vmem:[%s2445_s2 + $0xa8] sm:$0xff] }
  0x36   : > { %v401_v35 = vsel %vm354_vm3, %v400_v33, %v399_v34  ;;  %v1612_v33 = vld [vmem:[%s2445_s2 + $0x58] sm:$0xff] }
  0x39   : > { %369 = vrot.lane.b32.xlu0 %v355_v19, %s1980_s11  ;;  %372 = vrot.lane.b32.xlu1 %v355_v19, %s1981_s6 }
  0x3d   : > { %375 = vrot.lane.b32.xlu0 %v355_v19, %s1982_s14  ;;  %431 = vrot.lane.b32.xlu1 %v2141_v32, %s1976_s12 }
  0x41   : > { %403 = vrot.lane.b32.xlu0 %v401_v35, %s1976_s12  ;;  %406 = vrot.lane.b32.xlu1 %v401_v35, %s1978_s27  ;;  %s1983_s12 = smov 127  }
  0x45   : > { %409 = vrot.lane.b32.xlu0 %v401_v35, %s1977_s13  ;;  %412 = vrot.lane.b32.xlu1 %v401_v35, %s1979_s5  ;;  %s1984_s13 = smov 1  }
  0x49   : > { %415 = vrot.lane.b32.xlu0 %v401_v35, %s1980_s11  ;;  %418 = vrot.lane.b32.xlu1 %v401_v35, %s1981_s6 }
  0x4d   : > { %421 = vrot.lane.b32.xlu0 %v401_v35, %s1982_s14  ;;  %434 = vrot.lane.b32.xlu1 %v2141_v32, %s1982_s14  ;;  %s1673_s14 = sshll.u32 %s1958_s18, 2 }
  0x4e   : > { %s1478_s24 = sadd.s32 %s1674_s23, %s1673_s14 }
  0x4f   : > { %s1675_s18 = sshll.u32 %s1478_s24, 7 }
  0x50   : > { %s2390_s5 = scalar_lea.hbm %s2447_s4, %s1675_s18 }
  0xa3   : > { %v358_v38 = vpop.permute.xlu0 %357  ;;  %v364_v39 = vpop.permute.xlu1 %363 }
  0xa4   : > { %v379_v41 = vsel %vm378_vm6, %v355_v19, %v358_v38  ;;  %v1620_v38 = vld [vmem:[%s2445_s2 + $0x70] sm:$0xff] }
  0xa7   : > { %v361_v42 = vpop.permute.xlu0 %360  ;;  %v367_v43 = vpop.permute.xlu1 %366 }
  0xa8   : > { %v381_v44 = vsel %vm380_vm7, %v379_v41, %v361_v42  ;;  %v1630_v41 = vld [vmem:[%s2445_s2 + $0x98] sm:$0xff]  ;;  %v1636_v42 = vld [vmem:[%s2445_s2 + $0xa0] sm:$0xff] }
  0xa9   : > { %v383_v45 = vsel %vm382_vm8, %v381_v44, %v364_v39  ;;  %v1629_v39 = vld [vmem:[%s2445_s2 + $0x90] sm:$0xff] }
  0xaa   : > { %v385_v46 = vsel %vm384_vm9, %v383_v45, %v367_v43  ;;  %v1645_v43 = vld [vmem:[%s2445_s2 + $0xc0] sm:$0xff] }
  0xab   : > { %v370_v48 = vpop.permute.xlu0 %369  ;;  %v373_v49 = vpop.permute.xlu1 %372 }
  0xac   : > { %v387_v50 = vsel %vm386_vm10, %v385_v46, %v370_v48  ;;  %v1646_v48 = vld [vmem:[%s2445_s2 + $0xc8] sm:$0xff] }
  0xad   : > { %v389_v51 = vsel %vm388_vm11, %v387_v50, %v373_v49  ;;  %v1638_v50 = vld [vmem:[%s2445_s2 + $0xb0] sm:$0xff] }
  0xaf   : > { %v376_v52 = vpop.permute.xlu0 %375  ;;  %v432_v53 = vpop.permute.xlu1 %431 }
  0xb0   : > { %v391_v54 = vsel %vm390_vm12, %v389_v51, %v376_v52  ;;  %v1647_v51 = vld [vmem:[%s2445_s2 + $0xd0] sm:$0xff]  ;;  %v1639_v52 = vld [vmem:[%s2445_s2 + $0xb8] sm:$0xff] }
  0xb1   : > { %v433_v55 = vsel %vm315_vm13, %v391_v54, %v432_v53  ;;  %v1648_v53 = vld [vmem:[%s2445_s2 + $0xd8] sm:$0xff]  ;;  %v1654_v54 = vld [vmem:[%s2445_s2 + $0xe0] sm:$0xff] }
  0xb2   : > { %440 = vrot.lane.b32.xlu1 %v433_v55, %s1983_s12  ;;  %437 = vrot.lane.b32.xlu0 %v433_v55, %s1984_s13 }
  0xb3   : > { %1723 = vmatprep.subr.msk.mxu0 %vm465_vm14, %v433_v55  ;;  %1795 = vmatprep.subr.msk.mxu1 %vm465_vm14, %v433_v55  ;;  %v404_v58 = vpop.permute.xlu0 %403  ;;  %v407_v59 = vpop.permute.xlu1 %406 }
  0xb4   : > { %1724 = vmatpush3.msk.msra.mxu0 %vm465_vm14, %v433_v55  ;;  %1796 = vmatpush3.msk.msra.mxu1 %vm465_vm14, %v433_v55  ;;  %v424_v60 = vsel %vm378_vm6, %v401_v35, %v404_v58  ;;  %v1618_v35 = vld [vmem:[%s2445_s2 + $0x60] sm:$0xff]  ;;  %v1656_v58 = vld [vmem:[%s2445_s2 + $0xf0] sm:$0xff] }
  0xb5   : > { %v425_v63 = vsel %vm380_vm7, %v424_v60, %v407_v59  ;;  %1729 = vmatmul.mubr.msk.f32.vlgmr.msra.gmra.mxu1 %vm452_vm5, %v1598_v56  ;;  %1726 = vmatmul.mubr.msk.f32.vlgmr.msra.gmra.mxu0 %vm452_vm5, %v1596_v57  ;;  %v1663_v55 = vld [vmem:[%s2445_s2 + $0x100] sm:$0xff]  ;;  %v1655_v56 = vld [vmem:[%s2445_s2 + $0xe8] sm:$0xff]  ;;  %v1665_v59 = vld [vmem:[%s2445_s2 + $0x110] sm:$0xff] }
  0xb6   : > { %763 = vrot.lane.b32.xlu0 %v2141_v32, %s1984_s13  ;;  %766 = vrot.lane.b32.xlu1 %v2141_v32, %s1983_s12  ;;  %v1664_v57 = vld [vmem:[%s2445_s2 + $0x108] sm:$0xff]  ;;  %v1657_v60 = vld [vmem:[%s2445_s2 + $0xf8] sm:$0xff] }
  0xb7   : > { %v410_v0 = vpop.permute.xlu0 %409  ;;  %v413_v1 = vpop.permute.xlu1 %412  ;;  %1733 = vmatprep.mubr.msk.f32.mxu1 %vm452_vm5, %v443_v61  ;;  %1741 = vmatprep.mubr.msk.f32.mxu0 %vm452_vm5, %v1609_v62  ;;  %v1666_v61 = vld [vmem:[%s2445_s2 + $0x118] sm:$0xff] }
  0xb8   : > { %v426_v2 = vsel %vm382_vm8, %v425_v63, %v410_v0 }
  0xb9   : > { %v427_v3 = vsel %vm384_vm9, %v426_v2, %v413_v1 }
  0xbb   : > { %v416_v4 = vpop.permute.xlu0 %415  ;;  %v419_v5 = vpop.permute.xlu1 %418 }
  0xbc   : > { %v428_v6 = vsel %vm386_vm10, %v427_v3, %v416_v4 }
  0xbd   : > { %v429_v7 = vsel %vm388_vm11, %v428_v6, %v419_v5 }
  0xbf   : > { %v422_v8 = vpop.permute.xlu0 %421  ;;  %v435_v9 = vpop.permute.xlu1 %434 }
  0xc0   : > { %v430_v10 = vsel %vm390_vm12, %v429_v7, %v422_v8 }
  0xc1   : > { %v2203_v11 = vsel %vm316_vm15, %v430_v10, %v435_v9 }
  0xc2   : > { %1099 = vrot.lane.b32.xlu1 %v2203_v11, %s1983_s12  ;;  %1096 = vrot.lane.b32.xlu0 %v2203_v11, %s1984_s13  ;;  %s1592_s13 = sshll.u32 %s2100_s28, 5  ;;  %s1986_s12 = smov [#allocation3]  }
  0xc3   : > { %s291_s7 = scalar_lea.vmem [#allocation3], %s1592_s13  ;;  %s1886_s6 = sshll.u32 %s1986_s12, 4  ;;  %s1887_s6 = int_to_ptr.vmem [resolvable:$false] %s1886_s6 }
  0xc4   : > { %s1481_s9 = sshll.u32 %s291_s7, 4  ;;  %s1888_s13 = scalar_lea.vmem %s1887_s6, 1024  ;;  %s2385_s9 = int_to_ptr.vmem [resolvable:$true] %s1481_s9 }
  0xc5   : > { %s1882_s11 = scalar_lea.vmem %s2385_s9, 512  ;;  %p1889_p10 = scmp.lt.s32.totalorder %s2385_s9, %s1887_s6 }
  0xc6   : > { %1440 = vperm.xlu1 %1881, %v1430_v12   ;;  %1435 = vperm.xlu0 %1880, %v1429_v13   ;;  %p1883_p5 = scmp.ne.s32.totalorder %s2385_s9, %s1882_s11  ;;  %p1890_p11 = scmp.lt.s32.totalorder %s1888_s13, %s1882_s11 }
  0xc8   : > { %p1884_p6 = pnand %p1883_p5, %p2074_p8  ;;  %p1891_p12 = por %p1890_p11, %p1889_p10 }
  0xca   : > { %1450 = vperm.xlu0 %1880, %v1432_v15   ;;  %1445 = vperm.xlu1 %1881, %v1431_v16   ;;  %p1885_p7 = pneg %p1884_p6 }
  0xcc   : > { %p1892_p13 = pnand %p1891_p12, %p1885_p7 }
 0x124   : > { %v441_v20 = vpop.permute.xlu1 %440  ;;  %v438_v21 = vpop.permute.xlu0 %437 }
 0x125   : > { %v442_v22 = vsel %vm2222_vm0, 0.0, %v441_v20  ;;  %v439_v23 = vsel %vm2226_vm1, 0.0, %v438_v21 }
 0x126   : > { %1731 = vmatprep.subr.msk.mxu1 %vm465_vm14, %v439_v23  ;;  %1739 = vmatprep.subr.msk.mxu0 %vm465_vm14, %v442_v22 }
 0x127   : > { %1732 = vmatpush3.msk.msra.mxu1 %vm465_vm14, %v439_v23  ;;  %1740 = vmatpush3.msk.msra.mxu0 %vm465_vm14, %v442_v22 }
 0x128   : > { %1734 = vmatmul.mubr.msk.f32.vlgmr.msra.gmra.mxu1 %vm452_vm5, %v444_v24  ;;  %1742 = vmatmul.mubr.msk.f32.vlgmr.msra.gmra.mxu0 %vm452_vm5, %v1610_v25  ;;  %v764_v28 = vpop.permute.xlu0 %763  ;;  %v767_v29 = vpop.permute.xlu1 %766 }
 0x129   : > { %v765_v30 = vsel %vm2226_vm1, 0.0, %v764_v28  ;;  %1736 = vmatprep.mubr.msk.f32.mxu1 %vm452_vm5, %v445_v26  ;;  %1744 = vmatprep.mubr.msk.f32.mxu0 %vm452_vm5, %v1611_v27  ;;  %v768_v34 = vsel %vm2222_vm0, 0.0, %v767_v29 }
 0x12a   : > { %1747 = vmatprep.subr.msk.mxu1 %vm465_vm14, %v765_v30  ;;  %1755 = vmatprep.subr.msk.mxu0 %vm465_vm14, %v2141_v32 }
 0x12b   : > { %1748 = vmatpush3.msk.msra.mxu1 %vm465_vm14, %v765_v30  ;;  %1756 = vmatpush3.msk.msra.mxu0 %vm465_vm14, %v2141_v32  ;;  %v1628_v32 = vld [vmem:[%s2445_s2 + $0x88] sm:$0xff] }
 0x12c   : > { %1737 = vmatmul.mubr.msk.f32.gmra.mxu1 %vm452_vm5, %v446_v31  ;;  %1745 = vmatmul.mubr.msk.f32.gmra.mxu0 %vm452_vm5, %v1612_v33 }
 0x12d   : > { %1749 = vmatprep.mubr.msk.f32.mxu1 %vm452_vm5, %v1618_v35  ;;  %1763 = vmatprep.subr.msk.mxu1 %vm465_vm14, %v768_v34 }
 0x12e   : > { %1757 = vmatprep.mubr.msk.f32.mxu0 %vm452_vm5, %v1627_v36 }
 0x130   : > { %1750 = vmatmul.mubr.msk.f32.vlgmr.msra.gmra.mxu1 %vm452_vm5, %v1619_v37  ;;  %1758 = vmatmul.mubr.msk.f32.vlgmr.msra.gmra.mxu0 %vm452_vm5, %v1628_v32 }
 0x131   : > { %1764 = vmatpush3.msk.msra.mxu1 %vm465_vm14, %v768_v34  ;;  %1752 = vmatprep.mubr.msk.f32.mxu1 %vm452_vm5, %v1620_v38 }
 0x132   : > { %1779 = vmatprep.subr.msk.mxu1 %vm465_vm14, %v2203_v11  ;;  %1760 = vmatprep.mubr.msk.f32.mxu0 %vm452_vm5, %v1629_v39 }
 0x134   : > { %v1100_v44 = vpop.permute.xlu1 %1099  ;;  %1753 = vmatmul.mubr.msk.f32.gmra.mxu1 %vm452_vm5, %v1621_v40  ;;  %v1097_v45 = vpop.permute.xlu0 %1096  ;;  %1761 = vmatmul.mubr.msk.f32.gmra.mxu0 %vm452_vm5, %v1630_v41 }
 0x135   : > { %v1098_v46 = vsel %vm2226_vm1, 0.0, %v1097_v45  ;;  %1765 = vmatprep.mubr.msk.f32.mxu1 %vm452_vm5, %v1636_v42  ;;  %1773 = vmatprep.mubr.msk.f32.mxu0 %vm452_vm5, %v1645_v43  ;;  %v1101_v49 = vsel %vm2222_vm0, 0.0, %v1100_v44 }
 0x136   : > { %1771 = vmatprep.subr.msk.mxu0 %vm465_vm14, %v1098_v46 }
 0x137   : > { %1772 = vmatpush3.msk.msra.mxu0 %vm465_vm14, %v1098_v46 }
 0x138   : > { %1766 = vmatmul.mubr.msk.f32.vlgmr.msra.gmra.mxu1 %vm452_vm5, %v1637_v47  ;;  %1787 = vmatprep.subr.msk.mxu0 %vm465_vm14, %v1101_v49 }
 0x139   : > { %1780 = vmatpush3.msk.msra.mxu1 %vm465_vm14, %v2203_v11  ;;  %1774 = vmatmul.mubr.msk.f32.vlgmr.msra.gmra.mxu0 %vm452_vm5, %v1646_v48 }
 0x13a   : > { %1788 = vmatpush3.msk.msra.mxu0 %vm465_vm14, %v1101_v49  ;;  %1768 = vmatprep.mubr.msk.f32.mxu1 %vm452_vm5, %v1638_v50 }
 0x13b   : > { %1776 = vmatprep.mubr.msk.f32.mxu0 %vm452_vm5, %v1647_v51 }
 0x13c   : > { %1769 = vmatmul.mubr.msk.f32.gmra.mxu1 %vm452_vm5, %v1639_v52 }
 0x13d   : > { %1777 = vmatmul.mubr.msk.f32.gmra.mxu0 %vm452_vm5, %v1648_v53  ;;  %1781 = vmatprep.mubr.msk.f32.mxu1 %vm452_vm5, %v1654_v54 }
 0x13e   : > { %1789 = vmatprep.mubr.msk.f32.mxu0 %vm452_vm5, %v1663_v55 }
 0x140   : > { %1782 = vmatmul.mubr.msk.f32.vlgmr.msra.gmra.mxu1 %vm452_vm5, %v1655_v56 }
 0x141   : > { %1790 = vmatmul.mubr.msk.f32.vlgmr.msra.gmra.mxu0 %vm452_vm5, %v1664_v57  ;;  %1784 = vmatprep.mubr.msk.f32.mxu1 %vm452_vm5, %v1656_v58  ;;  %v1436_v52 = vpop.permute.xlu0 %1435  ;;  %v1441_v57 = vpop.permute.xlu1 %1440 }
 0x142   : > { %1792 = vmatprep.mubr.msk.f32.mxu0 %vm452_vm5, %v1665_v59 }
 0x144   : > { %1785 = vmatmul.mubr.msk.f32.gmra.mxu1 %vm452_vm5, %v1657_v60 }
 0x145   : > { %1793 = vmatmul.mubr.msk.f32.gmra.mxu0 %vm452_vm5, %v1666_v61 }
 0x175   : > { %v1727_v62 = vpop.f32.mrf.mxu0  ;;  %v1730_v63 = vpop.f32.mrf.mxu1 }
 0x177   : > { %v535_v0 = vpop.f32.mrf.mxu0  ;;  %v545_v1 = vpop.f32.mrf.mxu1 }
 0x1e8   : > { %v1735_v2 = vpop.f32.mrf.mxu1  ;;  %v1743_v3 = vpop.f32.mrf.mxu0 }
 0x1e9   : > { %v641_v10 = vadd.f32 %v1735_v2, %v1727_v62 }
 0x1ea   : > { %v635_v4 = vpop.f32.mrf.mxu1  ;;  %v740_v5 = vpop.f32.mrf.mxu0 }
 0x1eb   : > { %v636_v13 = vadd.f32 %v635_v4, %v535_v0  ;;  %v760_v16 = vadd.f32 %v1743_v3, %v641_v10  ;;  %v1446_v10 = vpop.permute.xlu1 %1445 }
 0x1ec   : > { %v1738_v6 = vpop.f32.mrf.mxu1  ;;  %v1746_v7 = vpop.f32.mrf.mxu0 }
 0x1ed   : > { %v651_v17 = vadd.f32 %v1738_v6, %v1730_v63  ;;  %v759_v20 = vadd.f32 %v740_v5, %v636_v13  ;;  %v1451_v6 = vpop.permute.xlu0 %1450 }
 0x1ee   : > { %v645_v8 = vpop.f32.mrf.mxu1  ;;  %v750_v9 = vpop.f32.mrf.mxu0 }
 0x1ef   : > { %v646_v21 = vadd.f32 %v645_v8, %v545_v1  ;;  %v762_v25 = vadd.f32 %v1746_v7, %v651_v17 }
 0x1f0   : > { %v1751_v11 = vpop.f32.mrf.mxu1  ;;  %v1759_v12 = vpop.f32.mrf.mxu0 }
 0x1f1   : > { %v875_v22 = vadd.f32 %v1751_v11, %v760_v16  ;;  %v761_v28 = vadd.f32 %v750_v9, %v646_v21 }
 0x1f2   : > { %v855_v14 = vpop.f32.mrf.mxu1  ;;  %v964_v15 = vpop.f32.mrf.mxu0 }
 0x1f3   : > { %v874_v26 = vadd.f32 %v855_v14, %v759_v20  ;;  %v984_v29 = vadd.f32 %v1759_v12, %v875_v22 }
 0x1f4   : > { %v1754_v18 = vpop.f32.mrf.mxu1  ;;  %v1762_v19 = vpop.f32.mrf.mxu0 }
 0x1f5   : > { %v877_v30 = vadd.f32 %v1754_v18, %v762_v25  ;;  %v983_v34 = vadd.f32 %v964_v15, %v874_v26 }
 0x1f6   : > { %v865_v23 = vpop.f32.mrf.mxu1  ;;  %v974_v24 = vpop.f32.mrf.mxu0 }
 0x1f7   : > { %v876_v35 = vadd.f32 %v865_v23, %v761_v28  ;;  %v986_v38 = vadd.f32 %v1762_v19, %v877_v30 }
 0x1f8   : > { %v1767_v27 = vpop.f32.mrf.mxu1 }
 0x1f9   : > { %v1775_v31 = vpop.f32.mrf.mxu0  ;;  %v1093_v36 = vadd.f32 %v1767_v27, %v984_v29  ;;  %v985_v42 = vadd.f32 %v974_v24, %v876_v35 }
 0x1fa   : > { %v1073_v33 = vpop.f32.mrf.mxu1 }
 0x1fb   : > { %v1188_v37 = vpop.f32.mrf.mxu0  ;;  %v1092_v39 = vadd.f32 %v1073_v33, %v983_v34  ;;  %v1208_v43 = vadd.f32 %v1775_v31, %v1093_v36 }
 0x1fc   : > { %v1770_v32 = vpop.f32.mrf.mxu1 }
 0x1fd   : > { %v1778_v40 = vpop.f32.mrf.mxu0  ;;  %v1095_v44 = vadd.f32 %v1770_v32, %v986_v38  ;;  %v1207_v47 = vadd.f32 %v1188_v37, %v1092_v39 }
 0x1fe   : > { %v1083_v41 = vpop.f32.mrf.mxu1 }
 0x1ff   : > { %v1198_v45 = vpop.f32.mrf.mxu0  ;;  %v1094_v48 = vadd.f32 %v1083_v41, %v985_v42  ;;  %v1210_v53 = vadd.f32 %v1778_v40, %v1095_v44 }
 0x200   : > { %v1783_v46 = vpop.f32.mrf.mxu1 }
 0x201   : > { %v1317_v49 = vadd.f32 %v1783_v46, %v1208_v43  ;;  %v1791_v50 = vpop.f32.mrf.mxu0  ;;  %v1209_v59 = vadd.f32 %v1198_v45, %v1094_v48 }
 0x202   : > { %v1297_v51 = vpop.f32.mrf.mxu1 }
 0x203   : > { %v1316_v54 = vadd.f32 %v1297_v51, %v1207_v47  ;;  %v1426_v55 = vadd.f32 %v1791_v50, %v1317_v49  ;;  %v1406_v56 = vpop.f32.mrf.mxu0 }
 0x204   : > { %v1786_v58 = vpop.f32.mrf.mxu1 }
 0x205   : > { %v1454_v60 = vadd.f32 %v1441_v57, %v1426_v55  ;;  %v1319_v61 = vadd.f32 %v1786_v58, %v1210_v53  ;;  %v1425_v62 = vadd.f32 %v1406_v56, %v1316_v54  ;;  %v1794_v63 = vpop.f32.mrf.mxu0 }
 0x206   : > { %v1307_v0 = vpop.f32.mrf.mxu1 }
 0x207   : > { %v1458_v1 = vmax.f32 %v1454_v60, 0.0  ;;  %v1453_v2 = vadd.f32 %v1436_v52, %v1425_v62  ;;  %v1318_v3 = vadd.f32 %v1307_v0, %v1209_v59  ;;  %v1428_v4 = vadd.f32 %v1794_v63, %v1319_v61  ;;  %v1416_v5 = vpop.f32.mrf.mxu0 }
 0x209   : > { %1462 = vst [vmem:[%s291_s7 + $0x8] sm:$0xff] %v1458_v1  ;;  %v1457_v7 = vmax.f32 %v1453_v2, 0.0  ;;  %v1427_v8 = vadd.f32 %v1416_v5, %v1318_v3  ;;  %v1456_v9 = vadd.f32 %v1451_v6, %v1428_v4 }
 0x20b   : > { %1461 = vst [vmem:[%s291_s7] sm:$0xff] %v1457_v7  ;;  %v1460_v11 = vmax.f32 %v1456_v9, 0.0  ;;  %v1455_v12 = vadd.f32 %v1446_v10, %v1427_v8 }
 0x20d   : > { %1464 = vst [vmem:[%s291_s7 + $0x18] sm:$0xff] %v1460_v11  ;;  %v1459_v13 = vmax.f32 %v1455_v12, 0.0 }
 0x20f   : > { %1463 = vst [vmem:[%s291_s7 + $0x10] sm:$0xff] %v1459_v13 }
 0x210   : > { %1895 = shalt.err (!%p1892_p13)
}
 0x211   : > { %s1896_s14 = scalar_lea.hbm %s2390_s5, 512  ;;  %s1900_s7 = scalar_lea.hbm %s2447_s4, 2048 }
 0x212   : > { %p1897_p0 = scmp.ne.s32.totalorder %s2390_s5, %s1896_s14  ;;  %p1901_p3 = scmp.lt.s32.totalorder %s2390_s5, %s2447_s4 }
 0x213   : > { %p1902_p4 = scmp.lt.s32.totalorder %s1900_s7, %s1896_s14 }
 0x214   : > { %p1898_p1 = pnand %p1897_p0, %p2074_p8 }
 0x215   : > { %p1903_p5 = por %p1902_p4, %p1901_p3 }
 0x216   : > { %p1899_p2 = pneg %p1898_p1 }
 0x218   : > { %p1904_p6 = pnand %p1903_p5, %p1899_p2 }
 0x21a   : > { %1907 = shalt.err (!%p1904_p6)
}
 0x21b   : > { %s1987_s27 = smov 128   ;;  %s1988_s11 = smov 8  }
 0x21c   : > { %1797 = dma.vmem_to_hbm [thread:$0]  (%p2074_p8), %s2385_s9, 512, %s2390_s5, %s1466_s10, %s1987_s27, %s1987_s27, %s1988_s11  }
 0x21d PF: > { %p1803_p7 = scmp.ge.s32.totalorder %s1974_s22, 2  ;;  %s1496_s12 = sand.u32 1, %s1946_s15  }
 0x21e   : > { %s1497_s6 = scalar_lea.sflag [#allocation4], %s1496_s12 }
 0x21f   : > { %p1800_p10 = pnand %p1803_p7, %p2078_p9 }
 0x221   : > { %p1801_p11 = pneg %p1800_p10 }
 0x223   : > { %1941 = dma.done.wait (%p1801_p11), %s1497_s6, 512  }
 0x224   : > { %1943 = vsyncadd (%p1801_p11), %s1497_s6, 4294966784  ;;  %s17_s22 = sadd.s32 1, %s1974_s22   ;;  %s2457_s15 = smov %s1950_s16 }
 0x225   : > { %p14_p12 = scmp.ge.s32.totalorder %s17_s22, 6   ;;  %s2458_s16 = smov %s1954_s17 }
 0x226   : > { %s2459_s17 = smov %s2086_s8  ;;  %s2460_s18 = smov %s1966_s20 }
 0x227   : > { %s2461_s19 = smov %s1970_s21  ;;  %s2462_s20 = smov %s2465_s25 }
 0x228   : > { %s2463_s21 = smov %s2469_s26  ;;  %16 = sbr.rel (!%p14_p12) target bundleno = 5 (0x5), region = 128 }
 0x22d   :  { %1502 = vsyncpa [#allocation4], 1 }
 0x22e   :  { %1504 = vsyncpa [#allocation4 + $0x1], 1 }

</bundles_post_ra>
